<compile_context>
chip_gen: v7x
topology: tpu7x:2x2x1
jax: 0.10.0
libtpu: 0.0.40
codegen_flags: <defaults>
</compile_context>

<pallas_src>
import functools

import jax
import jax.numpy as jnp
from jax.experimental import pallas as pl
from jax.experimental.pallas import tpu as pltpu


# ------------------------------ device budgets ------------------------------

def _vmem_limit_bytes():
    """~48 MiB on v7x (64 MiB/TC physical), ~96 MiB on v5e/v6e (128 MiB)."""
    try:
        cap = pltpu.get_tpu_info().vmem_capacity_bytes
    except Exception:
        cap = 64 * 1024 * 1024
    return min(int(cap * 0.75), 100 * 1024 * 1024)


def _pick_row_block(h_out, w_out, c4, cpad, batch, vmem_limit):
    """Largest divisor TH of H_out that fits the VMEM budget; keep >=2 grid steps."""
    k = 4 * c4
    w1 = w_out + 1

    def est_bytes(th):
        m = th * w_out
        blocks = (th * w1 * c4 * 2      # main phase rows (bf16)
                  + w1 * c4 * 2         # halo row (bf16)
                  + k * cpad * 2        # folded weights (bf16)
                  + cpad * 4            # BN shift (f32)
                  + m * cpad * 2)       # output block (bf16)
        interm = m * (k * 2 + cpad * 4 + cpad * 2)   # xcat + f32 acc + bf16 y
        return 2 * blocks + interm                   # double-buffered pipeline

    divs = [d for d in range(1, h_out + 1) if h_out % d == 0]
    th = 1
    for d in divs:
        if d <= 512 and est_bytes(d) <= vmem_limit // 2:
            th = d
    # Keep at least 2 parallel grid steps so both v7x TensorCores get work.
    if batch * (h_out // th) < 2:
        for d in reversed(divs):
            if d < th and batch * (h_out // d) >= 2:
                th = d
                break
    return th


# ------------------------------ Pallas kernel ------------------------------

def _conv_bn_relu_kernel(main_ref, halo_ref, w_ref, shift_ref, o_ref, *, th, w_out):
    """TH output rows per step: stride-2 3x3 conv == 2x2 conv over the phase grid.

    main_ref : (1, TH,  W_out+1, 4*Cin) bf16 -- phase rows rb*TH .. rb*TH+TH-1
    halo_ref : (1, 1,   W_out+1, 4*Cin) bf16 -- phase row rb*TH+TH (halo)
    w_ref    : (16*Cin, Cpad)           bf16 -- BN-scale-folded taps, cells along K
    shift_ref: (1, Cpad)                f32  -- folded BatchNorm shift
    o_ref    : (1, TH, W_out, Cpad)     bf16 -- lane-dense (Cpad % 128 == 0)
    """
    m = main_ref[0]                                    # (TH, W1, C4)
    halo = halo_ref[0]                                 # (1,  W1, C4)
    if th > 1:
        bot = jnp.concatenate([m[1:], halo], axis=0)   # phase rows shifted by +1
    else:
        bot = halo

    # Four 2x2-cell operands concatenated along K -> one MXU pass (K = 16*Cin).
    x_cells = jnp.concatenate(
        [m[:, :w_out, :],        # cell (di=0, dj=0)
         m[:, 1:, :],            # cell (di=0, dj=1)
         bot[:, :w_out, :],      # cell (di=1, dj=0)
         bot[:, 1:, :]],         # cell (di=1, dj=1)
        axis=-1)                                       # (TH, W_out, 16*Cin)
    x2 = x_cells.reshape(th * w_out, -1)               # (M, K) bf16

    acc = jnp.dot(x2, w_ref[...], preferred_element_type=jnp.float32)  # (M, Cpad)

    # Fused BN shift + ReLU epilogue in f32 on the VPU; bf16 lane-dense store.
    y = jnp.maximum(acc + shift_ref[...], 0.0)
    o_ref[0] = y.reshape(th, w_out, -1).astype(o_ref.dtype)


# ------------------------------ parameter folding ------------------------------

def fold_params(conv_w, gamma, beta, running_mean, running_var, eps=1e-5):
    """Fold BN scale into the f32 master weights, regroup taps per 2x2 phase cell,
    pad C_out to a multiple of 128 lanes, then cast weights once to bf16."""
    c_out, c_in, _, _ = conv_w.shape
    scale = gamma / jnp.sqrt(running_var + eps)                     # (Cout,)
    shift = beta - running_mean * scale

    w = jnp.transpose(conv_w, (2, 3, 1, 0)).astype(jnp.float32)     # (kh, kw, Cin, Cout)
    w = w * scale[None, None, None, :]                              # fold BN scale (f32)

    # wd[di, dj, pr, pc, c, o] = W[kh=2*di+pr, kw=2*dj+pc, c, o]  (0 if tap outside 3x3)
    wd = jnp.zeros((2, 2, 2, 2, c_in, c_out), jnp.float32)
    for di in range(2):
        for dj in range(2):
            for pr in range(2):
                for pc in range(2):
                    kh, kw = 2 * di + pr, 2 * dj + pc
                    if kh < 3 and kw < 3:
                        wd = wd.at[di, dj, pr, pc].set(w[kh, kw])

    cpad = ((c_out + 127) // 128) * 128
    wk = wd.reshape(16 * c_in, c_out)                               # cells along K
    wk = jnp.pad(wk, ((0, 0), (0, cpad - c_out))).astype(jnp.bfloat16)
    shift_p = jnp.pad(shift.astype(jnp.float32), (0, cpad - c_out)).reshape(1, cpad)
    return dict(w=wk, shift=shift_p, c_out=c_out)


# ------------------------------ wrapper ------------------------------

def basic_conv3x3(x_nchw, folded):
    """PyTorch-equivalent forward: NCHW in, NCHW f32 out (stride 2, padding 1)."""
    wk, shift, c_out = folded['w'], folded['shift'], folded['c_out']
    cpad = wk.shape[-1]
    b, c_in, h, w_in = x_nchw.shape
    h_out, w_out = (h + 1) // 2, (w_in + 1) // 2
    c4 = 4 * c_in

    # NCHW -> NHWC bf16 -> zero-pad to 2*(out+1) spatial -> 2x2 space-to-depth
    # phase layout (same byte count as the input, NOT an im2col blow-up).
    x = jnp.transpose(x_nchw, (0, 2, 3, 1)).astype(jnp.bfloat16)
    x = jnp.pad(x, ((0, 0), (1, 2 * h_out + 1 - h), (1, 2 * w_out + 1 - w_in), (0, 0)))
    x = x.reshape(b, h_out + 1, 2, w_out + 1, 2, c_in)
    xp = jnp.transpose(x, (0, 1, 3, 2, 4, 5)).reshape(b, h_out + 1, w_out + 1, c4)

    vmem_limit = _vmem_limit_bytes()
    th = _pick_row_block(h_out, w_out, c4, cpad, b, vmem_limit)
    nb = h_out // th

    out_nhwc = pl.pallas_call(
        functools.partial(_conv_bn_relu_kernel, th=th, w_out=w_out),
        out_shape=jax.ShapeDtypeStruct((b, h_out, w_out, cpad), jnp.bfloat16),
        grid=(b, nb),
        in_specs=[
            # TH phase rows per step (the same array is passed twice: once for the
            # main rows, once for the single +1 halo row -> ~(TH+1)/TH input reads).
            pl.BlockSpec((1, th, w_out + 1, c4), lambda bi, rb: (bi, rb, 0, 0)),
            pl.BlockSpec((1, 1, w_out + 1, c4),
                         lambda bi, rb, _t=th: (bi, rb * _t + _t, 0, 0)),
            pl.BlockSpec((4 * c4, cpad), lambda bi, rb: (0, 0)),
            pl.BlockSpec((1, cpad), lambda bi, rb: (0, 0)),
        ],
        out_specs=pl.BlockSpec((1, th, w_out, cpad), lambda bi, rb: (bi, rb, 0, 0)),
        compiler_params=pltpu.CompilerParams(
            dimension_semantics=("parallel", "parallel"),
            vmem_limit_bytes=vmem_limit),
    )(xp, xp, wk, shift)

    out = out_nhwc[:, :, :, :c_out]                      # drop channel padding
    return jnp.transpose(out, (0, 3, 1, 2)).astype(jnp.float32)   # back to NCHW f32


# ------------------------------ reference (plain XLA, f32) ------------------------------

def _reference(x, conv_w, gamma, beta, mean, var, eps=1e-5):
    y = jax.lax.conv_general_dilated(
        x, conv_w, window_strides=(2, 2), padding=((1, 1), (1, 1)),
        dimension_numbers=('NCHW', 'OIHW', 'NCHW'))
    s = (gamma / jnp.sqrt(var + eps)).reshape(1, -1, 1, 1)
    bsh = (beta - mean * gamma / jnp.sqrt(var + eps)).reshape(1, -1, 1, 1)
    return jnp.maximum(y * s + bsh, 0.0)


# ------------------------------ main ------------------------------

if __name__ == "__main__":
    key = jax.random.PRNGKey(0)
    k_x, k_w, k_g, k_b, k_m, k_v = jax.random.split(key, 6)

    B, CIN, H, W = 2, 4, 16, 16
    COUT = 32

    x = jax.random.normal(k_x, (B, CIN, H, W), jnp.float32)
    conv_w = 0.05 * jax.random.normal(k_w, (COUT, CIN, 3, 3), jnp.float32)   # torch OIHW
    gamma = 1.0 + 0.1 * jax.random.normal(k_g, (COUT,), jnp.float32)
    beta = 0.1 * jax.random.normal(k_b, (COUT,), jnp.float32)
    running_mean = 0.1 * jax.random.normal(k_m, (COUT,), jnp.float32)
    running_var = jax.random.uniform(k_v, (COUT,), jnp.float32, minval=0.5, maxval=1.5)

    folded = fold_params(conv_w, gamma, beta, running_mean, running_var)

    fwd = jax.jit(lambda inp: basic_conv3x3(inp, folded))
    out = fwd(x)
    jax.block_until_ready(out)
    assert out.shape == (B, COUT, H // 2, W // 2)
    assert out.dtype == jnp.float32

    # Validate against an f32 XLA reference; bf16 MXU inputs/outputs -> loose tolerance.
    ref = _reference(x, conv_w, gamma, beta, running_mean, running_var)
    max_err = float(jnp.max(jnp.abs(out - ref)))
    assert max_err < 5e-2, f"max abs error {max_err}"

    print("KERNEL_OK")
</pallas_src>

<mosaic_0001>
module attributes {stable_mosaic.version = 11 : i64} {
  func.func @_conv_bn_relu_kernel(%arg0: i32, %arg1: i32, %arg2: memref<1x8x9x16xbf16, #tpu.memory_space<vmem>>, %arg3: memref<1x1x9x16xbf16, #tpu.memory_space<vmem>>, %arg4: memref<64x128xbf16, #tpu.memory_space<vmem>>, %arg5: memref<1x128xf32, #tpu.memory_space<vmem>>, %arg6: memref<1x8x8x128xbf16, #tpu.memory_space<vmem>>) attributes {dimension_semantics = [#tpu.dimension_semantics<parallel>, #tpu.dimension_semantics<parallel>], iteration_bounds = array<i64: 2, 1>, scalar_prefetch = 0 : i64, scratch_operands = 0 : i64, tpu.core_type = #tpu.core_type<tc>, window_params = [{transform_indices = @transform_0, window_bounds = array<i64: 1, 8, 9, 16>}, {transform_indices = @transform_1, window_bounds = array<i64: 1, 1, 9, 16>}, {pipeline_mode = #tpu.pipeline_mode<synchronous>, transform_indices = @transform_2, window_bounds = array<i64: 64, 128>}, {pipeline_mode = #tpu.pipeline_mode<synchronous>, transform_indices = @transform_3, window_bounds = array<i64: 1, 128>}, {transform_indices = @transform_4, window_bounds = array<i64: 1, 8, 8, 128>}]} {
    %c0 = arith.constant 0 : index
    %c0_0 = arith.constant 0 : index
    %c0_1 = arith.constant 0 : index
    %c0_2 = arith.constant 0 : index
    %0 = vector.load %arg2[%c0, %c0_0, %c0_1, %c0_2] : memref<1x8x9x16xbf16, #tpu.memory_space<vmem>>, vector<1x8x9x16xbf16>
    %1 = vector.shape_cast %0 : vector<1x8x9x16xbf16> to vector<8x9x16xbf16>
    %c0_3 = arith.constant 0 : index
    %c0_4 = arith.constant 0 : index
    %c0_5 = arith.constant 0 : index
    %c0_6 = arith.constant 0 : index
    %2 = vector.load %arg3[%c0_3, %c0_4, %c0_5, %c0_6] : memref<1x1x9x16xbf16, #tpu.memory_space<vmem>>, vector<1x1x9x16xbf16>
    %3 = vector.shape_cast %2 : vector<1x1x9x16xbf16> to vector<1x9x16xbf16>
    %4 = vector.extract_strided_slice %1 {offsets = [1, 0, 0], sizes = [7, 9, 16], strides = [1, 1, 1]} : vector<8x9x16xbf16> to vector<7x9x16xbf16>
    %5 = tpu.concatenate %4, %3 in 0 : vector<7x9x16xbf16>, vector<1x9x16xbf16> -> vector<8x9x16xbf16>
    %6 = vector.extract_strided_slice %1 {offsets = [0, 0, 0], sizes = [8, 8, 16], strides = [1, 1, 1]} : vector<8x9x16xbf16> to vector<8x8x16xbf16>
    %7 = vector.extract_strided_slice %1 {offsets = [0, 1, 0], sizes = [8, 8, 16], strides = [1, 1, 1]} : vector<8x9x16xbf16> to vector<8x8x16xbf16>
    %8 = vector.extract_strided_slice %5 {offsets = [0, 0, 0], sizes = [8, 8, 16], strides = [1, 1, 1]} : vector<8x9x16xbf16> to vector<8x8x16xbf16>
    %9 = vector.extract_strided_slice %5 {offsets = [0, 1, 0], sizes = [8, 8, 16], strides = [1, 1, 1]} : vector<8x9x16xbf16> to vector<8x8x16xbf16>
    %10 = tpu.concatenate %6, %7, %8, %9 in 2 : vector<8x8x16xbf16>, vector<8x8x16xbf16>, vector<8x8x16xbf16>, vector<8x8x16xbf16> -> vector<8x8x64xbf16>
    %11 = vector.shape_cast %10 : vector<8x8x64xbf16> to vector<64x64xbf16>
    %c0_7 = arith.constant 0 : index
    %c0_8 = arith.constant 0 : index
    %12 = vector.load %arg4[%c0_7, %c0_8] : memref<64x128xbf16, #tpu.memory_space<vmem>>, vector<64x128xbf16>
    %cst = arith.constant dense<0.000000e+00> : vector<64x128xf32>
    %13 = tpu.matmul %11, %12, %cst {dimension_numbers = #tpu.dot_dimension_numbers<[1], [0], [0], [1], [0, 0, 1, 1], [], []>} : vector<64x64xbf16>, vector<64x128xbf16>, vector<64x128xf32> -> vector<64x128xf32>
    %c0_9 = arith.constant 0 : index
    %c0_10 = arith.constant 0 : index
    %14 = vector.load %arg5[%c0_9, %c0_10] : memref<1x128xf32, #tpu.memory_space<vmem>>, vector<1x128xf32>
    %15 = vector.broadcast %14 : vector<1x128xf32> to vector<64x128xf32>
    %16 = arith.addf %13, %15 : vector<64x128xf32>
    %cst_11 = arith.constant 0.000000e+00 : f32
    %17 = vector.broadcast %cst_11 : f32 to vector<64x128xf32>
    %18 = arith.maximumf %16, %17 : vector<64x128xf32>
    %19 = vector.shape_cast %18 : vector<64x128xf32> to vector<8x8x128xf32>
    %20 = arith.truncf %19 : vector<8x8x128xf32> to vector<8x8x128xbf16>
    %c0_12 = arith.constant 0 : index
    %c0_13 = arith.constant 0 : index
    %c0_14 = arith.constant 0 : index
    %c0_15 = arith.constant 0 : index
    %21 = vector.load %arg6[%c0_12, %c0_13, %c0_14, %c0_15] : memref<1x8x8x128xbf16, #tpu.memory_space<vmem>>, vector<1x8x8x128xbf16>
    %22 = vector.shape_cast %21 : vector<1x8x8x128xbf16> to vector<8x8x128xbf16>
    %23 = vector.shape_cast %20 : vector<8x8x128xbf16> to vector<1x8x8x128xbf16>
    tpu.vector_store %arg6[%c0_12, %c0_13, %c0_14, %c0_15], %23 {strides = array<i32>} : memref<1x8x8x128xbf16, #tpu.memory_space<vmem>>, vector<1x8x8x128xbf16>,
    return
  }
  func.func @transform_0(%arg0: i32, %arg1: i32) -> (i32, i32, i32, i32) {
    %c0_i32 = arith.constant 0 : i32
    %c0_i32_0 = arith.constant 0 : i32
    %c0_i32_1 = arith.constant 0 : i32
    return %arg0, %arg1, %c0_i32, %c0_i32_0 : i32, i32, i32, i32
  }
  func.func @transform_1(%arg0: i32, %arg1: i32) -> (i32, i32, i32, i32) {
    %c8_i32 = arith.constant 8 : i32
    %0 = arith.muli %arg1, %c8_i32 : i32
    %c8_i32_0 = arith.constant 8 : i32
    %1 = arith.addi %0, %c8_i32_0 : i32
    %c0_i32 = arith.constant 0 : i32
    %c0_i32_1 = arith.constant 0 : i32
    %c0_i32_2 = arith.constant 0 : i32
    return %arg0, %1, %c0_i32, %c0_i32_1 : i32, i32, i32, i32
  }
  func.func @transform_2(%arg0: i32, %arg1: i32) -> (i32, i32) {
    %c0_i32 = arith.constant 0 : i32
    %c0_i32_0 = arith.constant 0 : i32
    %c0_i32_1 = arith.constant 0 : i32
    return %c0_i32, %c0_i32_0 : i32, i32
  }
  func.func @transform_3(%arg0: i32, %arg1: i32) -> (i32, i32) {
    %c0_i32 = arith.constant 0 : i32
    %c0_i32_0 = arith.constant 0 : i32
    %c0_i32_1 = arith.constant 0 : i32
    return %c0_i32, %c0_i32_0 : i32, i32
  }
  func.func @transform_4(%arg0: i32, %arg1: i32) -> (i32, i32, i32, i32) {
    %c0_i32 = arith.constant 0 : i32
    %c0_i32_0 = arith.constant 0 : i32
    %c0_i32_1 = arith.constant 0 : i32
    return %arg0, %arg1, %c0_i32, %c0_i32_0 : i32, i32, i32, i32
  }
}

</mosaic_0001>

<bundles_post_ra>
// kernel: _lambda_.1
= control target key start
LH: loop header
LB: loop body
LE: loop exit
PB: predicated region body
PF: predicated region fallthrough
CT: control target
= control target key end

     0   :  { %s1029_s15 = smov 0   ;;  %s1031_s16 = smov 0   ;;  %s1204_s0 = inlined_call_operand.vmem [shape: bf16[2,9,9,16], index: 0, kind: input, shape index: {}, may-alias: {0,1}]   ;;  %s1205_s1 = inlined_call_operand.vmem [shape: bf16[2,9,9,16], index: 1, kind: input, shape index: {}, may-alias: {0,1}]   ;;  %s1206_s2 = inlined_call_operand.vmem [shape: bf16[64,128], index: 2, kind: input, shape index: {}]   ;;  %s1207_s3 = inlined_call_operand.vmem [shape: f32[1,128], index: 3, kind: input, shape index: {}]   ;;  %s1208_s4 = inlined_call_operand.vmem [shape: bf16[2,8,8,128], index: 4, kind: output, shape index: {}]  }
   0x1   :  { %s1033_s17 = smov 0  }
   0x2 LB: > { %s26_s18 = sadd.s32 1, %s995_s16  ;;  %p831_p0 = scmp.ge.s32.totalorder %s999_s17, 1  ;;  %s999_s17 = sphi %s1033_s17, %s14_s17   ;;  %s995_s16 = sphi %s1031_s16, %s1210_s16   ;;  %s991_s15 = sphi %s1029_s15, %s1209_s15  }
   0x3   : > { %p28_p1 = scmp.ge.s32.totalorder %s26_s18, 2  ;;  %p218_p2 = scmp.lt.s32.totalorder %s999_s17, 3 }
   0x5   : > { %s1212_s18 = smov (%p28_p1, %s26_s18), 0  ;;  %p219_p3 = pnand %p831_p0, %p218_p2 }
   0x6   : > { %p275_p4 = scmp.lt.s32.totalorder (!%p219_p3), %s991_s15, 1  ;;  %s1001_s23 = smov (!%p219_p3), 32   ;;  %v973_v57 = vld [vmem:[%s1206_s2] sm:$0xff] (!%p219_p3)   ;;  %v974_v60 = vld [vmem:[%s1206_s2 + $0x8] sm:$0xff] (!%p219_p3)   ;;  %v975_v63 = vld [vmem:[%s1206_s2 + $0x10] sm:$0xff] (!%p219_p3)   ;;  %vm496_vm0 = vcmask (!%p219_p3), 130048  }
   0x7   : > { %222 = sbr.rel (%p219_p3) target bundleno = 409 (0x199), region = 36  ;;  %s1002_s24 = smov (!%p219_p3), 16   ;;  %902 = vmatprep.subr.bf16.mxu0 (!%p219_p3), %v973_v57  ;;  %918 = vmatprep.subr.bf16.mxu1 (!%p219_p3), %v973_v57  ;;  %vm521_vm1 = vcmask (!%p219_p3), 261120   ;;  %vm538_vm2 = vcmask (!%p219_p3), 392192   ;;  %vm614_vm3 = vcmask (!%p219_p3), 523264  }
   0x8   : > { %903 = vmatpush3.bf16.msra.mxu0 (!%p219_p3), %v973_v57  ;;  %922 = vmatpush3.bf16.msra.mxu1 (!%p219_p3), %v973_v57  ;;  %s1003_s11 = smov (!%p219_p3), 48  }
   0x9   : > { %904 = vmatprep.subr.bf16.mxu0 (!%p219_p3), %v974_v60  ;;  %919 = vmatprep.subr.bf16.mxu1 (!%p219_p3), %v974_v60 }
   0xc   : > { %905 = vmatpush3.bf16.msra.mxu0 (!%p219_p3), %v974_v60  ;;  %923 = vmatpush3.bf16.msra.mxu1 (!%p219_p3), %v974_v60 }
   0xd   : > { %906 = vmatprep.subr.bf16.mxu0 (!%p219_p3), %v975_v63  ;;  %920 = vmatprep.subr.bf16.mxu1 (!%p219_p3), %v975_v63 }
   0xe   : > { %s1214_s15 = smov (!%p275_p4, %s991_s15), 1 }
   0xf   : > { %s926_s19 = smul.u32 72, %s1214_s15  ;;  %s870_s14 = sshll.u32 %s1214_s15, 5 }
  0x10   : > { %907 = vmatpush3.bf16.msra.mxu0 %v975_v63  ;;  %924 = vmatpush3.bf16.msra.mxu1 %v975_v63  ;;  %s311_s21 = scalar_lea.vmem %s1208_s4, %s870_s14 }
  0x11   : > { %s1055_s22 = scalar_lea.vmem %s1204_s0, %s926_s19  ;;  %s869_s27 = sadd.s32 64, %s926_s19 }
  0x12   : > { %v1058_v0 = vld [vmem:[%s1055_s22 + $0x10] sm:$0xf]  ;;  %v319_v1 = vld [vmem:[%s1055_s22 + $0x14] sm:$0x1]  ;;  %v1062_v2 = vld [vmem:[%s1055_s22 + $0x8] sm:$0xf]  ;;  %s300_s6 = scalar_lea.vmem %s1205_s1, %s869_s27 }
  0x13   : > { %v845_v3 = vcombine.low %v1058_v0, %v1058_v0  ;;  %v317_v4 = vld [vmem:[%s1055_s22 + $0xc] sm:$0x1]  ;;  %v844_v5 = vcombine.low %v1062_v2, %v1062_v2  ;;  %v1070_v6 = vld [vmem:[%s1055_s22 + $0x20] sm:$0xf]  ;;  %v323_v7 = vld [vmem:[%s1055_s22 + $0x24] sm:$0x1]  ;;  %v838_v8 = vcombine.low %v1058_v0, %v319_v1 }
  0x14   : > { %v837_v9 = vcombine.low %v1062_v2, %v317_v4  ;;  %v840_v10 = vcombine.low %v1070_v6, %v323_v7  ;;  %v1077_v11 = vld [vmem:[%s1055_s22] sm:$0xf]  ;;  %v315_v12 = vld [vmem:[%s1055_s22 + $0x4] sm:$0x1]  ;;  %v1081_v13 = vld [vmem:[%s1055_s22 + $0x28] sm:$0xf]  ;;  %v847_v62 = vcombine.low %v1070_v6, %v1070_v6 }
  0x15   : > { %456 = vrot.lane.b32.xlu1 %v845_v3, %s1001_s23  ;;  %454 = vrot.lane.b32.xlu0 %v844_v5, %s1001_s23  ;;  %v836_v14 = vcombine.low %v1077_v11, %v315_v12  ;;  %v325_v15 = vld [vmem:[%s1055_s22 + $0x2c] sm:$0x1]  ;;  %v1088_v16 = vld [vmem:[%s1055_s22 + $0x18] sm:$0xf]  ;;  %v389_v29 = vshll.u32 %v838_v8, 16  ;;  %v387_v47 = vshrl.u32 %v838_v8, 16  ;;  %v848_v61 = vcombine.low %v1081_v13, %v1081_v13 }
  0x16   : > { %v401_v17 = vshrl.u32 %v840_v10, 16  ;;  %v403_v18 = vshll.u32 %v840_v10, 16  ;;  %v841_v19 = vcombine.low %v1081_v13, %v325_v15  ;;  %v321_v20 = vld [vmem:[%s1055_s22 + $0x1c] sm:$0x1]  ;;  %v382_v23 = vshll.u32 %v837_v9, 16 }
  0x17   : > { %v373_v21 = vshrl.u32 %v836_v14, 16  ;;  %v375_v22 = vshll.u32 %v836_v14, 16  ;;  %v839_v24 = vcombine.low %v1088_v16, %v321_v20  ;;  %v1094_v25 = vld [vmem:[%s1055_s22 + $0x38] sm:$0xf]  ;;  %v329_v30 = vld [vmem:[%s1055_s22 + $0x3c] sm:$0x1]  ;;  %v846_v1 = vcombine.low %v1088_v16, %v1088_v16 }
  0x18   : > { %v405_v26 = vrot.slane %v403_v18, 1  ;;  %v408_v27 = vshrl.u32 %v841_v19, 16  ;;  %v410_v28 = vshll.u32 %v841_v19, 16  ;;  %v380_v32 = vshrl.u32 %v837_v9, 16  ;;  %v1098_v35 = vld [vmem:[%s1055_s22 + $0x30] sm:$0xf] }
  0x19   : > { %v377_v31 = vrot.slane %v375_v22, 1  ;;  %v384_v33 = vrot.slane %v382_v23, 1  ;;  %v396_v34 = vshll.u32 %v839_v24, 16  ;;  %v843_v38 = vcombine.low %v1094_v25, %v329_v30  ;;  %v327_v39 = vld [vmem:[%s1055_s22 + $0x34] sm:$0x1]  ;;  %v976_v5 = vld [vmem:[%s1206_s2 + $0x18] sm:$0xff]  }
  0x1a   : > { %v1100_v36 = vor.u32 %v405_v26, %v401_v17  ;;  %v412_v37 = vrot.slane %v410_v28, 1  ;;  %v842_v41 = vcombine.low %v1098_v35, %v327_v39  ;;  %v394_v43 = vshrl.u32 %v839_v24, 16  ;;  %v330_v3 = vld [vmem:[%s300_s6] sm:$0xf]  ;;  %v331_v7 = vld [vmem:[%s300_s6 + $0x4] sm:$0x1]  ;;  %908 = vmatprep.subr.bf16.mxu0 %v976_v5  ;;  %921 = vmatprep.subr.bf16.mxu1 %v976_v5 }
  0x1b   : > { %v378_v40 = vor.u32 %v377_v31, %v373_v21  ;;  %v398_v44 = vrot.slane %v396_v34, 1  ;;  %v424_v45 = vshll.u32 %v843_v38, 16  ;;  %v385_v46 = vor.u32 %v384_v33, %v380_v32  ;;  %909 = vmatpush3.bf16.msra.mxu0 %v976_v5  ;;  %925 = vmatpush3.bf16.msra.mxu1 %v976_v5 }
  0x1c   : > { %436 = vrot.lane.b32.xlu1 %v1100_v36, %s1002_s24  ;;  %v1107_v42 = vor.u32 %v412_v37, %v408_v27  ;;  %v391_v48 = vrot.slane %v389_v29, 1  ;;  %v417_v49 = vshll.u32 %v842_v41, 16  ;;  %v422_v51 = vshrl.u32 %v843_v38, 16 }
  0x1d   : > { %428 = vrot.lane.b32.xlu0 %v378_v40, %s1002_s24  ;;  %v399_v50 = vor.u32 %v398_v44, %v394_v43  ;;  %v426_v52 = vrot.slane %v424_v45, 1  ;;  %v415_v54 = vshrl.u32 %v842_v41, 16  ;;  %v849_v59 = vcombine.low %v1098_v35, %v1098_v35 }
  0x1e   : > { %v392_v53 = vor.u32 %v391_v48, %v387_v47  ;;  %v419_v55 = vrot.slane %v417_v49, 1  ;;  %v851_v4 = vcombine.low %v330_v3, %v330_v3  ;;  %v850_v8 = vcombine.low %v1094_v25, %v1094_v25 }
  0x1f   : > { %v427_v56 = vor.u32 %v426_v52, %v422_v51  ;;  %v852_v9 = vcombine.low %v330_v3, %v331_v7 }
  0x20   : > { %438 = vrot.lane.b32.xlu1 %v1107_v42, %s1002_s24  ;;  %v420_v58 = vor.u32 %v419_v55, %v415_v54 }
  0x21   : > { %430 = vrot.lane.b32.xlu0 %v385_v46, %s1002_s24  ;;  %v476_v10 = vshll.u32 %v852_v9, 16  ;;  %v474_v12 = vshrl.u32 %v852_v9, 16 }
  0x23   : > { %v478_v14 = vrot.slane %v476_v10, 1 }
  0x24   : > { %434 = vrot.lane.b32.xlu1 %v399_v50, %s1002_s24 }
  0x25   : > { %432 = vrot.lane.b32.xlu0 %v392_v53, %s1002_s24  ;;  %v479_v15 = vor.u32 %v478_v14, %v474_v12 }
  0x28   : > { %442 = vrot.lane.b32.xlu1 %v427_v56, %s1002_s24 }
  0x29   : > { %440 = vrot.lane.b32.xlu0 %v420_v58, %s1002_s24 }
  0x2c   : > { %464 = vrot.lane.b32.xlu1 %v849_v59, %s1001_s23 }
  0x2d   : > { %462 = vrot.lane.b32.xlu0 %v848_v61, %s1001_s23 }
  0x30   : > { %460 = vrot.lane.b32.xlu1 %v847_v62, %s1001_s23 }
  0x31   : > { %458 = vrot.lane.b32.xlu0 %v846_v1, %s1001_s23 }
  0x34   : > { %468 = vrot.lane.b32.xlu1 %v851_v4, %s1001_s23 }
  0x35   : > { %466 = vrot.lane.b32.xlu0 %v850_v8, %s1001_s23 }
  0x38   : > { %482 = vrot.lane.b32.xlu1 %v392_v53, %s1003_s11 }
  0x39   : > { %480 = vrot.lane.b32.xlu0 %v385_v46, %s1003_s11 }
  0x3c   : > { %490 = vrot.lane.b32.xlu1 %v420_v58, %s1003_s11 }
  0x3d   : > { %488 = vrot.lane.b32.xlu0 %v1107_v42, %s1003_s11 }
  0x40   : > { %486 = vrot.lane.b32.xlu1 %v1100_v36, %s1003_s11 }
  0x41   : > { %484 = vrot.lane.b32.xlu0 %v399_v50, %s1003_s11 }
  0x44   : > { %494 = vrot.lane.b32.xlu1 %v479_v15, %s1003_s11 }
  0x45   : > { %492 = vrot.lane.b32.xlu0 %v427_v56, %s1003_s11 }
  0x87   : > { %v457_v17 = vpop.permute.xlu1 %456  ;;  %v455_v18 = vpop.permute.xlu0 %454 }
  0x8e   : > { %v437_v19 = vpop.permute.xlu1 %436 }
  0x8f   : > { %v429_v20 = vpop.permute.xlu0 %428 }
  0x90   : > { %v499_v36 = vsel %vm496_vm0, %v1077_v11, %v429_v20  ;;  %v511_v11 = vsel %vm496_vm0, %v1070_v6, %v437_v19 }
  0x91   : > { %v523_v40 = vsel %vm521_vm1, %v499_v36, %v455_v18 }
  0x92   : > { %v439_v21 = vpop.permute.xlu1 %438 }
  0x93   : > { %v431_v22 = vpop.permute.xlu0 %430 }
  0x94   : > { %v502_v33 = vsel %vm496_vm0, %v1062_v2, %v431_v22  ;;  %v514_v2 = vsel %vm496_vm0, %v1081_v13, %v439_v21 }
  0x95   : > { %v525_v38 = vsel %vm521_vm1, %v502_v33, %v457_v17 }
  0x96   : > { %v435_v23 = vpop.permute.xlu1 %434 }
  0x97   : > { %v433_v24 = vpop.permute.xlu0 %432  ;;  %v508_v50 = vsel %vm496_vm0, %v1088_v16, %v435_v23 }
  0x98   : > { %v505_v51 = vsel %vm496_vm0, %v1058_v0, %v433_v24 }
  0x9a   : > { %v443_v26 = vpop.permute.xlu1 %442 }
  0x9b   : > { %v441_v27 = vpop.permute.xlu0 %440  ;;  %v520_v57 = vsel %vm496_vm0, %v1094_v25, %v443_v26  ;;  %v853_v25 = vld [vmem:[%s1207_s3] ss:$0 sm:$0xff] }
  0x9c   : > { %v517_v58 = vsel %vm496_vm0, %v1098_v35, %v441_v27 }
  0x9e   : > { %v465_v28 = vpop.permute.xlu1 %464 }
  0x9f   : > { %v463_v29 = vpop.permute.xlu0 %462  ;;  %v533_v44 = vsel %vm521_vm1, %v514_v2, %v465_v28 }
  0xa0   : > { %v531_v46 = vsel %vm521_vm1, %v511_v11, %v463_v29 }
  0xa2   : > { %v461_v30 = vpop.permute.xlu1 %460 }
  0xa3   : > { %v459_v31 = vpop.permute.xlu0 %458  ;;  %v529_v6 = vsel %vm521_vm1, %v508_v50, %v461_v30 }
  0xa4   : > { %v527_v53 = vsel %vm521_vm1, %v505_v51, %v459_v31 }
  0xa6   : > { %v469_v32 = vpop.permute.xlu1 %468 }
  0xa7   : > { %v467_v34 = vpop.permute.xlu0 %466  ;;  %v537_v0 = vsel %vm521_vm1, %v520_v57, %v469_v32 }
  0xa8   : > { %v535_v60 = vsel %vm521_vm1, %v517_v58, %v467_v34 }
  0xaa   : > { %v483_v37 = vpop.permute.xlu1 %482 }
  0xab   : > { %v542_v39 = vsel %vm538_vm2, %v525_v38, %v483_v37  ;;  %v481_v41 = vpop.permute.xlu0 %480 }
  0xac   : > { %v540_v42 = vsel %vm538_vm2, %v523_v40, %v481_v41 }
  0xad   : > { %v854_v43 = vcombine.low %v540_v42, %v542_v39 }
  0xae   : > { %v491_v45 = vpop.permute.xlu1 %490 }
  0xaf   : > { %v550_v47 = vsel %vm538_vm2, %v533_v44, %v491_v45  ;;  %910 = vmatprep.mubr.msk.bf16.mxu0 %vm614_vm3, %v854_v43  ;;  %v489_v48 = vpop.permute.xlu0 %488 }
  0xb0   : > { %v548_v49 = vsel %vm538_vm2, %v531_v46, %v489_v48 }
  0xb1   : > { %v856_v13 = vcombine.low %v548_v49, %v550_v47 }
  0xb2   : > { %v487_v52 = vpop.permute.xlu1 %486 }
  0xb3   : > { %v546_v54 = vsel %vm538_vm2, %v529_v6, %v487_v52  ;;  %914 = vmatprep.mubr.msk.bf16.mxu1 %vm614_vm3, %v856_v13  ;;  %v485_v55 = vpop.permute.xlu0 %484 }
  0xb4   : > { %v544_v56 = vsel %vm538_vm2, %v527_v53, %v485_v55 }
  0xb5   : > { %v855_v16 = vcombine.low %v544_v56, %v546_v54 }
  0xb6   : > { %v495_v59 = vpop.permute.xlu1 %494 }
  0xb7   : > { %v554_v61 = vsel %vm538_vm2, %v537_v0, %v495_v59  ;;  %911 = vmatmul.mubr.msk.bf16.vlgmr.msra.gmra.mrb[0].mxu0 %vm614_vm3, %v855_v16  ;;  %v493_v62 = vpop.permute.xlu0 %492 }
  0xb8   : > { %v552_v63 = vsel %vm538_vm2, %v535_v60, %v493_v62 }
  0xb9   : > { %v857_v1 = vcombine.low %v552_v63, %v554_v61 }
  0xbb   : > { %915 = vmatmul.mubr.msk.bf16.vlgmr.msra.gmra.mrb[0].mxu1 %vm614_vm3, %v857_v1 }
 0x18a   : > { %v912_v35 = vpop.f32.mrb[0].mxu0 }
 0x18b   : > { %v670_v3 = vadd.f32 %v912_v35, %v853_v25  ;;  %v661_v4 = vpop.f32.mrb[1].mxu0 }
 0x18c   : > { %v662_v5 = vadd.f32 %v853_v25, %v661_v4  ;;  %v913_v7 = vpop.f32.mrb[2].mxu0 }
 0x18d   : > { %v673_v8 = vadd.f32 %v913_v7, %v853_v25  ;;  %v664_v9 = vpop.f32.mrb[3].mxu0  ;;  %v694_v14 = vmax.f32 %v670_v3, 0.0 }
 0x18e   : > { %v665_v10 = vadd.f32 %v853_v25, %v664_v9  ;;  %v916_v12 = vpop.f32.mrb[0].mxu1  ;;  %v692_v19 = vmax.f32 %v662_v5, 0.0 }
 0x18f   : > { %v695_v15 = vmax.f32 %v673_v8, 0.0  ;;  %v686_v17 = vadd.f32 %v916_v12, %v853_v25  ;;  %v677_v18 = vpop.f32.mrb[1].mxu1 }
 0x190   : > { %v693_v20 = vmax.f32 %v665_v10, 0.0  ;;  %v678_v21 = vadd.f32 %v853_v25, %v677_v18  ;;  %v917_v22 = vpop.f32.mrb[2].mxu1 }
 0x191   : > { %v879_v23 = vpack.c.bf16 %v695_v15, %v694_v14  ;;  %v689_v24 = vadd.f32 %v917_v22, %v853_v25  ;;  %v680_v26 = vpop.f32.mrb[3].mxu1  ;;  %v698_v29 = vmax.f32 %v686_v17, 0.0 }
 0x192   : > { %v874_v27 = vpack.c.bf16 %v693_v20, %v692_v19  ;;  %v681_v28 = vadd.f32 %v853_v25, %v680_v26  ;;  %v696_v31 = vmax.f32 %v678_v21, 0.0 }
 0x193   : > { %891 = vst [vmem:[%s311_s21 + $0x8] sm:$0xff] %v879_v23   ;;  %v699_v30 = vmax.f32 %v689_v24, 0.0 }
 0x194   : > { %875 = vst [vmem:[%s311_s21] sm:$0xff] %v874_v27   ;;  %v697_v32 = vmax.f32 %v681_v28, 0.0 }
 0x195   : > { %v889_v33 = vpack.c.bf16 %v699_v30, %v698_v29 }
 0x196   : > { %v884_v34 = vpack.c.bf16 %v697_v32, %v696_v31 }
 0x197   : > { %893 = vst [vmem:[%s311_s21 + $0x18] sm:$0xff] %v889_v33  }
 0x198   : > { %892 = vst [vmem:[%s311_s21 + $0x10] sm:$0xff] %v884_v34  }
 0x199 PF: > { %s14_s17 = sadd.s32 1, %s999_s17   ;;  %s1209_s15 = smov %s995_s16 }
 0x19a   : > { %p11_p5 = scmp.ge.s32.totalorder %s14_s17, 4   ;;  %s1210_s16 = smov %s1212_s18 }
 0x19c   :  { %13 = sbr.rel (!%p11_p5) target bundleno = 2 (0x2), region = 69 }

</bundles_post_ra>
